<compile_context>
chip_gen: v6e
topology: v6e:2x2x1
jax: 0.10.0
libtpu: 0.0.40
codegen_flags: <defaults>
</compile_context>

<pallas_src>
import functools

import jax
import jax.numpy as jnp
from jax.experimental import pallas as pl
from jax.experimental.pallas import tpu as pltpu


def _round_up(x, m):
    return ((x + m - 1) // m) * m


def fc1_stats_kernel(x_ref, w1_ref, b1_ref, ssum_ref, ssq_ref,
                     *, n_real, tile_n, tiles_per_split, masked):
    c = pl.program_id(0)   # core-split axis ("parallel", v7x megacore)
    j = pl.program_id(1)   # N-tile accumulation axis ("arbitrary")

    # fc1 on the MXU: bf16 operands (pre-cast in the wrapper), f32 accumulation.
    h = jnp.dot(x_ref[...], w1_ref[...], preferred_element_type=jnp.float32)
    h = h + b1_ref[...]

    @pl.when(j == 0)
    def _():
        ssum_ref[...] = jnp.zeros_like(ssum_ref)
        ssq_ref[...] = jnp.zeros_like(ssq_ref)

    def accum(hv):
        ssum_ref[...] += jnp.sum(hv, axis=0, keepdims=True)
        ssq_ref[...] += jnp.sum(hv * hv, axis=0, keepdims=True)

    if masked:
        # Only tiles that overlap the zero-padded rows pay for the mask.
        start = (c * tiles_per_split + j) * tile_n
        touches_pad = start + tile_n > n_real

        @pl.when(touches_pad)
        def _():
            row = jax.lax.broadcasted_iota(jnp.int32, (tile_n, 1), 0) + start
            accum(jnp.where(row < n_real, h, 0.0))

        @pl.when(jnp.logical_not(touches_pad))
        def _():
            accum(h)
    else:
        accum(h)


def bn_relu_fc2_kernel(x_ref, w1_ref, b1_ref, ssum_ref, ssq_ref,
                       gamma_ref, beta_ref, w2r_ref, b2_ref, o_ref, *, inv_n):
    # Combine the per-split partial sums and finalize BatchNorm1d training-mode
    # statistics (biased variance, eps = 1e-5).  (splits, H) -> (1, H) is tiny.
    ssum = jnp.sum(ssum_ref[...], axis=0, keepdims=True)
    ssq = jnp.sum(ssq_ref[...], axis=0, keepdims=True)
    mean = ssum * inv_n
    var = ssq * inv_n - mean * mean
    inv_std = jax.lax.rsqrt(var + 1e-5)
    scale = gamma_ref[...] * inv_std
    shift = beta_ref[...] - mean * scale

    # Recompute fc1 for this tile (same bf16 operands as pass 1 -> the stats
    # match the values being normalized bit-for-bit); no h HBM round-trip.
    h = jnp.dot(x_ref[...], w1_ref[...], preferred_element_type=jnp.float32)
    h = h + b1_ref[...]

    h = h * scale + shift            # normalize + affine (f32, VPU)
    h = jnp.maximum(h, 0.0)          # ReLU

    # fc2 (output width 1) computed batch-on-lanes: (1,H) x (tile,H)^T ->
    # (1, tile), so the store below is a lane-dense unmasked vst.
    z = jax.lax.dot_general(
        w2r_ref[...], h,
        dimension_numbers=(((1,), (1,)), ((), ())),
        preferred_element_type=jnp.float32) + b2_ref[...]

    # Sigmoid via tanh: one EUP op, result exactly bounded in [0, 1].
    o_ref[...] = 0.5 * (jnp.tanh(0.5 * z) + 1.0)


def mlp_forward(x, w1, b1, gamma, beta, w2, b2, *, tile_n=512):
    n, d = x.shape
    h_dim = w1.shape[1]

    # N-tile: multiple of 128 so the batch-on-lanes output store stays
    # lane-dense; capped by the (rounded-up) batch size.
    tile = max(128, min(_round_up(tile_n, 128), _round_up(n, 128)))

    # Leading size-2 "parallel" axis on pass 1 whenever there is more than one
    # tile of work (v7x megacore sharding; harmless sequential on v5e/v6e).
    splits = 2 if pl.cdiv(n, tile) >= 2 else 1
    n_pad = _round_up(n, tile * splits)
    num_tiles = n_pad // tile
    tiles_per_split = num_tiles // splits
    masked = n_pad != n

    # One-time wrapper casts: bf16 MXU operands halve x / w1 DMA bytes and
    # avoid re-casting the resident w1 on every grid step.
    xb = x.astype(jnp.bfloat16)
    w1b = w1.astype(jnp.bfloat16)
    if masked:
        xb = jnp.pad(xb, ((0, n_pad - n), (0, 0)))

    vmem_limit = 48 * 1024 * 1024          # stays inside v7x's 64 MiB physical
    cparams_reduce = pltpu.CompilerParams(
        dimension_semantics=("parallel", "arbitrary"),
        vmem_limit_bytes=vmem_limit,
    )
    cparams_parallel = pltpu.CompilerParams(
        dimension_semantics=("parallel",),
        vmem_limit_bytes=vmem_limit,
    )

    # ---- Pass 1: fc1 + per-feature sum / sum-of-squares (no h writeback) ----
    ssum, ssq = pl.pallas_call(
        functools.partial(fc1_stats_kernel, n_real=n, tile_n=tile,
                          tiles_per_split=tiles_per_split, masked=masked),
        grid=(splits, tiles_per_split),
        in_specs=[
            pl.BlockSpec((tile, d), lambda c, j: (c * tiles_per_split + j, 0)),
            pl.BlockSpec((d, h_dim), lambda c, j: (0, 0)),    # w1 (resident)
            pl.BlockSpec((1, h_dim), lambda c, j: (0, 0)),    # b1 (resident)
        ],
        out_specs=[
            pl.BlockSpec((1, h_dim), lambda c, j: (c, 0)),    # partial sum
            pl.BlockSpec((1, h_dim), lambda c, j: (c, 0)),    # partial sumsq
        ],
        out_shape=(
            jax.ShapeDtypeStruct((splits, h_dim), jnp.float32),
            jax.ShapeDtypeStruct((splits, h_dim), jnp.float32),
        ),
        compiler_params=cparams_reduce,
    )(xb, w1b, b1)

    # ---- Pass 2: recompute fc1 -> BatchNorm (batch stats) -> ReLU -> fc2 -> sigmoid
    out_row = pl.pallas_call(
        functools.partial(bn_relu_fc2_kernel, inv_n=1.0 / n),
        grid=(num_tiles,),
        in_specs=[
            pl.BlockSpec((tile, d), lambda i: (i, 0)),        # x tile (bf16)
            pl.BlockSpec((d, h_dim), lambda i: (0, 0)),       # w1 (resident)
            pl.BlockSpec((1, h_dim), lambda i: (0, 0)),       # b1
            pl.BlockSpec((splits, h_dim), lambda i: (0, 0)),  # partial sums
            pl.BlockSpec((splits, h_dim), lambda i: (0, 0)),  # partial sumsqs
            pl.BlockSpec((1, h_dim), lambda i: (0, 0)),       # gamma
            pl.BlockSpec((1, h_dim), lambda i: (0, 0)),       # beta
            pl.BlockSpec((1, h_dim), lambda i: (0, 0)),       # w2 as a row
            pl.BlockSpec((1, 1), lambda i: (0, 0)),           # b2
        ],
        out_specs=pl.BlockSpec((1, tile), lambda i: (0, i)),  # batch on lanes
        out_shape=jax.ShapeDtypeStruct((1, n_pad), jnp.float32),
        compiler_params=cparams_parallel,
    )(xb, w1b, b1, ssum, ssq, gamma, beta, w2.reshape(1, h_dim), b2)

    # Drop row padding; put the single logit column back on the batch axis.
    return out_row[0, :n].reshape(n, 1)


def init_params(key, input_dim, hidden_dim):
    k1, k2, k3, k4 = jax.random.split(key, 4)
    # Deterministic synthetic init (uniform, roughly PyTorch fan-in scale).
    lim1 = 1.0 / (input_dim ** 0.5)
    lim2 = 1.0 / (hidden_dim ** 0.5)
    w1 = jax.random.uniform(k1, (input_dim, hidden_dim), jnp.float32, -lim1, lim1)
    b1 = jax.random.uniform(k2, (1, hidden_dim), jnp.float32, -lim1, lim1)
    gamma = jnp.ones((1, hidden_dim), jnp.float32)   # BatchNorm1d weight
    beta = jnp.zeros((1, hidden_dim), jnp.float32)   # BatchNorm1d bias
    w2 = jax.random.uniform(k3, (hidden_dim, 1), jnp.float32, -lim2, lim2)
    b2 = jax.random.uniform(k4, (1, 1), jnp.float32, -lim2, lim2)
    return w1, b1, gamma, beta, w2, b2


def ref_forward(x, w1, b1, gamma, beta, w2, b2):
    h = x @ w1 + b1
    mean = jnp.mean(h, axis=0, keepdims=True)
    var = jnp.mean((h - mean) ** 2, axis=0, keepdims=True)   # biased var
    h = (h - mean) * jax.lax.rsqrt(var + 1e-5) * gamma + beta
    h = jnp.maximum(h, 0.0)
    return jax.nn.sigmoid(h @ w2 + b2)


if __name__ == "__main__":
    N, INPUT_DIM, HIDDEN_DIM = 8, 32, 32

    key = jax.random.PRNGKey(0)
    kx, kp = jax.random.split(key)
    x = jax.random.normal(kx, (N, INPUT_DIM), jnp.float32)
    params = init_params(kp, INPUT_DIM, HIDDEN_DIM)

    out = mlp_forward(x, *params)
    jax.block_until_ready(out)

    assert out.shape == (N, 1), out.shape
    assert bool(jnp.all(jnp.isfinite(out)))
    # tanh-form sigmoid is exactly bounded in [0, 1].
    assert bool(jnp.all((out >= 0.0) & (out <= 1.0)))

    ref = ref_forward(x, *params)
    max_err = float(jnp.max(jnp.abs(out - ref)))
    assert max_err < 5e-2, max_err   # bf16 MXU operands for fc1

    print("KERNEL_OK")
</pallas_src>

<mosaic_0001>
module attributes {stable_mosaic.version = 11 : i64} {
  func.func @fc1_stats_kernel(%arg0: i32, %arg1: i32, %arg2: memref<128x32xbf16, #tpu.memory_space<vmem>>, %arg3: memref<32x32xbf16, #tpu.memory_space<vmem>>, %arg4: memref<1x32xf32, #tpu.memory_space<vmem>>, %arg5: memref<1x32xf32, #tpu.memory_space<vmem>>, %arg6: memref<1x32xf32, #tpu.memory_space<vmem>>) attributes {dimension_semantics = [#tpu.dimension_semantics<parallel>, #tpu.dimension_semantics<arbitrary>], iteration_bounds = array<i64: 1, 1>, scalar_prefetch = 0 : i64, scratch_operands = 0 : i64, tpu.core_type = #tpu.core_type<tc>, window_params = [{transform_indices = @transform_0, window_bounds = array<i64: 128, 32>}, {pipeline_mode = #tpu.pipeline_mode<synchronous>, transform_indices = @transform_1, window_bounds = array<i64: 32, 32>}, {pipeline_mode = #tpu.pipeline_mode<synchronous>, transform_indices = @transform_2, window_bounds = array<i64: 1, 32>}, {transform_indices = @transform_3, window_bounds = array<i64: 1, 32>}, {transform_indices = @transform_4, window_bounds = array<i64: 1, 32>}]} {
    %c0 = arith.constant 0 : index
    %c0_0 = arith.constant 0 : index
    %0 = vector.load %arg2[%c0, %c0_0] : memref<128x32xbf16, #tpu.memory_space<vmem>>, vector<128x32xbf16>
    %c0_1 = arith.constant 0 : index
    %c0_2 = arith.constant 0 : index
    %1 = vector.load %arg3[%c0_1, %c0_2] : memref<32x32xbf16, #tpu.memory_space<vmem>>, vector<32x32xbf16>
    %cst = arith.constant dense<0.000000e+00> : vector<128x32xf32>
    %2 = tpu.matmul %0, %1, %cst {dimension_numbers = #tpu.dot_dimension_numbers<[1], [0], [0], [1], [0, 0, 1, 1], [], []>} : vector<128x32xbf16>, vector<32x32xbf16>, vector<128x32xf32> -> vector<128x32xf32>
    %c0_3 = arith.constant 0 : index
    %c0_4 = arith.constant 0 : index
    %3 = vector.load %arg4[%c0_3, %c0_4] : memref<1x32xf32, #tpu.memory_space<vmem>>, vector<1x32xf32>
    %4 = vector.broadcast %3 : vector<1x32xf32> to vector<128x32xf32>
    %5 = arith.addf %2, %4 : vector<128x32xf32>
    %c0_i32 = arith.constant 0 : i32
    %6 = arith.cmpi eq, %arg1, %c0_i32 : i32
    %7 = arith.extui %6 : i1 to i32
    %c0_i32_5 = arith.constant 0 : i32
    %8 = arith.cmpi ne, %7, %c0_i32_5 : i32
    scf.if %8 {
      %cst_9 = arith.constant 0.000000e+00 : f32
      %19 = vector.broadcast %cst_9 : f32 to vector<1x32xf32>
      %c0_10 = arith.constant 0 : index
      %c0_11 = arith.constant 0 : index
      %20 = vector.load %arg5[%c0_10, %c0_11] : memref<1x32xf32, #tpu.memory_space<vmem>>, vector<1x32xf32>
      tpu.vector_store %arg5[%c0_10, %c0_11], %19 {strides = array<i32>} : memref<1x32xf32, #tpu.memory_space<vmem>>, vector<1x32xf32>,
      %cst_12 = arith.constant 0.000000e+00 : f32
      %21 = vector.broadcast %cst_12 : f32 to vector<1x32xf32>
      %c0_13 = arith.constant 0 : index
      %c0_14 = arith.constant 0 : index
      %22 = vector.load %arg6[%c0_13, %c0_14] : memref<1x32xf32, #tpu.memory_space<vmem>>, vector<1x32xf32>
      tpu.vector_store %arg6[%c0_13, %c0_14], %21 {strides = array<i32>} : memref<1x32xf32, #tpu.memory_space<vmem>>, vector<1x32xf32>,
    } else {
    }
    %c1_i32 = arith.constant 1 : i32
    %9 = arith.muli %arg0, %c1_i32 : i32
    %10 = arith.addi %9, %arg1 : i32
    %c128_i32 = arith.constant 128 : i32
    %11 = arith.muli %10, %c128_i32 : i32
    %c128_i32_6 = arith.constant 128 : i32
    %12 = arith.addi %11, %c128_i32_6 : i32
    %c8_i32 = arith.constant 8 : i32
    %13 = arith.cmpi sgt, %12, %c8_i32 : i32
    %14 = arith.extui %13 : i1 to i32
    %c0_i32_7 = arith.constant 0 : i32
    %15 = arith.cmpi ne, %14, %c0_i32_7 : i32
    scf.if %15 {
      %19 = tpu.iota {dimensions = array<i32: 0>} : vector<128x1xi32>
      %20 = vector.broadcast %11 : i32 to vector<128x1xi32>
      %21 = arith.addi %19, %20 : vector<128x1xi32>
      %c8_i32_9 = arith.constant 8 : i32
      %22 = vector.broadcast %c8_i32_9 : i32 to vector<128x1xi32>
      %23 = arith.cmpi slt, %21, %22 : vector<128x1xi32>
      %cst_10 = arith.constant 0.000000e+00 : f32
      %24 = vector.shape_cast %23 : vector<128x1xi1> to vector<128x1xi1>
      %25 = vector.broadcast %24 : vector<128x1xi1> to vector<128x32xi1>
      %26 = vector.broadcast %cst_10 : f32 to vector<128x32xf32>
      %27 = arith.select %25, %5, %26 : vector<128x32xi1>, vector<128x32xf32>
      %c0_11 = arith.constant 0 : index
      %c0_12 = arith.constant 0 : index
      %28 = vector.load %arg5[%c0_11, %c0_12] : memref<1x32xf32, #tpu.memory_space<vmem>>, vector<1x32xf32>
      %cst_13 = arith.constant dense<0.000000e+00> : vector<32xf32>
      %29 = vector.multi_reduction <add>, %27, %cst_13 [0] : vector<128x32xf32> to vector<32xf32>
      %30 = vector.shape_cast %29 : vector<32xf32> to vector<1x32xf32>
      %31 = arith.addf %28, %30 : vector<1x32xf32>
      %c0_14 = arith.constant 0 : index
      %c0_15 = arith.constant 0 : index
      %32 = vector.load %arg5[%c0_14, %c0_15] : memref<1x32xf32, #tpu.memory_space<vmem>>, vector<1x32xf32>
      tpu.vector_store %arg5[%c0_14, %c0_15], %31 {strides = array<i32>} : memref<1x32xf32, #tpu.memory_space<vmem>>, vector<1x32xf32>,
      %c0_16 = arith.constant 0 : index
      %c0_17 = arith.constant 0 : index
      %33 = vector.load %arg6[%c0_16, %c0_17] : memref<1x32xf32, #tpu.memory_space<vmem>>, vector<1x32xf32>
      %34 = arith.mulf %27, %27 : vector<128x32xf32>
      %cst_18 = arith.constant dense<0.000000e+00> : vector<32xf32>
      %35 = vector.multi_reduction <add>, %34, %cst_18 [0] : vector<128x32xf32> to vector<32xf32>
      %36 = vector.shape_cast %35 : vector<32xf32> to vector<1x32xf32>
      %37 = arith.addf %33, %36 : vector<1x32xf32>
      %c0_19 = arith.constant 0 : index
      %c0_20 = arith.constant 0 : index
      %38 = vector.load %arg6[%c0_19, %c0_20] : memref<1x32xf32, #tpu.memory_space<vmem>>, vector<1x32xf32>
      tpu.vector_store %arg6[%c0_19, %c0_20], %37 {strides = array<i32>} : memref<1x32xf32, #tpu.memory_space<vmem>>, vector<1x32xf32>,
    } else {
    }
    %true = arith.constant true
    %16 = arith.xori %13, %true : i1
    %17 = arith.extui %16 : i1 to i32
    %c0_i32_8 = arith.constant 0 : i32
    %18 = arith.cmpi ne, %17, %c0_i32_8 : i32
    scf.if %18 {
      %c0_9 = arith.constant 0 : index
      %c0_10 = arith.constant 0 : index
      %19 = vector.load %arg5[%c0_9, %c0_10] : memref<1x32xf32, #tpu.memory_space<vmem>>, vector<1x32xf32>
      %cst_11 = arith.constant dense<0.000000e+00> : vector<32xf32>
      %20 = vector.multi_reduction <add>, %5, %cst_11 [0] : vector<128x32xf32> to vector<32xf32>
      %21 = vector.shape_cast %20 : vector<32xf32> to vector<1x32xf32>
      %22 = arith.addf %19, %21 : vector<1x32xf32>
      %c0_12 = arith.constant 0 : index
      %c0_13 = arith.constant 0 : index
      %23 = vector.load %arg5[%c0_12, %c0_13] : memref<1x32xf32, #tpu.memory_space<vmem>>, vector<1x32xf32>
      tpu.vector_store %arg5[%c0_12, %c0_13], %22 {strides = array<i32>} : memref<1x32xf32, #tpu.memory_space<vmem>>, vector<1x32xf32>,
      %c0_14 = arith.constant 0 : index
      %c0_15 = arith.constant 0 : index
      %24 = vector.load %arg6[%c0_14, %c0_15] : memref<1x32xf32, #tpu.memory_space<vmem>>, vector<1x32xf32>
      %25 = arith.mulf %5, %5 : vector<128x32xf32>
      %cst_16 = arith.constant dense<0.000000e+00> : vector<32xf32>
      %26 = vector.multi_reduction <add>, %25, %cst_16 [0] : vector<128x32xf32> to vector<32xf32>
      %27 = vector.shape_cast %26 : vector<32xf32> to vector<1x32xf32>
      %28 = arith.addf %24, %27 : vector<1x32xf32>
      %c0_17 = arith.constant 0 : index
      %c0_18 = arith.constant 0 : index
      %29 = vector.load %arg6[%c0_17, %c0_18] : memref<1x32xf32, #tpu.memory_space<vmem>>, vector<1x32xf32>
      tpu.vector_store %arg6[%c0_17, %c0_18], %28 {strides = array<i32>} : memref<1x32xf32, #tpu.memory_space<vmem>>, vector<1x32xf32>,
    } else {
    }
    return
  }
  func.func @transform_0(%arg0: i32, %arg1: i32) -> (i32, i32) {
    %c1_i32 = arith.constant 1 : i32
    %0 = arith.muli %arg0, %c1_i32 : i32
    %1 = arith.addi %0, %arg1 : i32
    %c0_i32 = arith.constant 0 : i32
    %c0_i32_0 = arith.constant 0 : i32
    return %1, %c0_i32 : i32, i32
  }
  func.func @transform_1(%arg0: i32, %arg1: i32) -> (i32, i32) {
    %c0_i32 = arith.constant 0 : i32
    %c0_i32_0 = arith.constant 0 : i32
    %c0_i32_1 = arith.constant 0 : i32
    return %c0_i32, %c0_i32_0 : i32, i32
  }
  func.func @transform_2(%arg0: i32, %arg1: i32) -> (i32, i32) {
    %c0_i32 = arith.constant 0 : i32
    %c0_i32_0 = arith.constant 0 : i32
    %c0_i32_1 = arith.constant 0 : i32
    return %c0_i32, %c0_i32_0 : i32, i32
  }
  func.func @transform_3(%arg0: i32, %arg1: i32) -> (i32, i32) {
    %c0_i32 = arith.constant 0 : i32
    %c0_i32_0 = arith.constant 0 : i32
    return %arg0, %c0_i32 : i32, i32
  }
  func.func @transform_4(%arg0: i32, %arg1: i32) -> (i32, i32) {
    %c0_i32 = arith.constant 0 : i32
    %c0_i32_0 = arith.constant 0 : i32
    return %arg0, %c0_i32 : i32, i32
  }
}

</mosaic_0001>

<bundles_post_ra>
// kernel: tpu_custom_call.1
= control target key start
LH: loop header
LB: loop body
LE: loop exit
PB: predicated region body
PF: predicated region fallthrough
CT: control target
= control target key end

     0   :  { %10 = vsyncpa [#allocation3], 0  ;;  %vm120_vm0 = vcmask 261120   ;;  %s777_s0 = inlined_call_operand.vmem [shape: bf16[128,32], index: 0, kind: input, shape index: {}]   ;;  %s778_s1 = inlined_call_operand.vmem [shape: bf16[32,32], index: 1, kind: input, shape index: {}]   ;;  %s779_s2 = inlined_call_operand.vmem [shape: f32[1,32], index: 2, kind: input, shape index: {}]   ;;  %s780_s3 = inlined_call_operand.hbm [shape: f32[1,32], index: 3, kind: output, shape index: {0}]   ;;  %s781_s4 = inlined_call_operand.hbm [shape: f32[1,32], index: 4, kind: output, shape index: {1}]  }
   0x1   :  { %v642_v0 = vld [vmem:[%s778_s1 + $0x8] sm:$0xff]   ;;  %v643_v1 = vld [vmem:[%s778_s1] sm:$0xff]   ;;  %v648_v6 = vld [vmem:[%s777_s0 + $0x10] sm:$0xff]  }
   0x2   :  { %615 = vmatprep.subr.bf16.mxu0 %v642_v0  ;;  %635 = vmatprep.subr.bf16.mxu1 %v642_v0  ;;  %v644_v2 = vld [vmem:[%s777_s0] sm:$0xff]   ;;  %v645_v3 = vld [vmem:[%s777_s0 + $0x8] sm:$0xff]   ;;  %v649_v7 = vld [vmem:[%s777_s0 + $0x30] sm:$0xff]  }
   0x3   :  { %616 = vmatpush3.bf16.msra.mxu0 %v642_v0  ;;  %637 = vmatpush3.bf16.msra.mxu1 %v642_v0  ;;  %v646_v4 = vld [vmem:[%s777_s0 + $0x20] sm:$0xff]   ;;  %v647_v5 = vld [vmem:[%s777_s0 + $0x28] sm:$0xff]  }
   0x4   :  { %617 = vmatprep.subr.bf16.mxu0 %v643_v1  ;;  %636 = vmatprep.subr.bf16.mxu1 %v643_v1 }
   0x5   :  { %619 = vmatprep.mubr.msk.bf16.mxu0 %vm120_vm0, %v644_v2  ;;  %627 = vmatprep.mubr.msk.bf16.mxu1 %vm120_vm0, %v646_v4 }
   0x7   :  { %618 = vmatpush3.bf16.msra.mxu0 %v643_v1  ;;  %638 = vmatpush3.bf16.msra.mxu1 %v643_v1 }
   0xa   :  { %620 = vmatmul.mubr.msk.bf16.vlgmr.msra.gmra.mxu0 %vm120_vm0, %v645_v3  ;;  %628 = vmatmul.mubr.msk.bf16.vlgmr.msra.gmra.mxu1 %vm120_vm0, %v647_v5 }
   0xb   :  { %11 = vsyncpa [#allocation5], 0  ;;  %623 = vmatprep.mubr.msk.bf16.mxu0 %vm120_vm0, %v648_v6  ;;  %631 = vmatprep.mubr.msk.bf16.mxu1 %vm120_vm0, %v649_v7  ;;  %v650_v8 = vld [vmem:[%s777_s0 + $0x18] sm:$0xff]   ;;  %vm246_vm1 = vcmask 253952   ;;  %v696_v10 = vmov 0.0   ;;  %s698_s10 = smov [#allocation4]  }
   0xc   :  { %v651_v9 = vld [vmem:[%s777_s0 + $0x38] sm:$0xff]   ;;  %247 = vst.msk [vmem:[#allocation2] sm:$0x1] %vm246_vm1, %v696_v10  ;;  %248 = vst.msk [vmem:[#allocation4] sm:$0x1] %vm246_vm1, %v696_v10  ;;  %s697_s0 = smov [#allocation2]  }
   0xd   :  { %v586_v12 = vld [vmem:[%s779_s2] ss:$0 sm:$0xff]  ;;  %s558_s2 = sshll.u32 %s697_s0, 4  ;;  %s568_s11 = sshll.u32 %s698_s10, 4  ;;  %s559_s2 = int_to_ptr.vmem [resolvable:$true] %s558_s2  ;;  %s569_s11 = int_to_ptr.vmem [resolvable:$true] %s568_s11 }
   0xe   :  { %s652_s12 = scalar_lea.vmem %s559_s2, 16  ;;  %s656_s13 = scalar_lea.vmem %s559_s2, 32 }
   0xf   :  { %p653_p0 = scmp.ne.s32.totalorder %s559_s2, %s652_s12  ;;  %p657_p1 = scmp.lt.s32.totalorder %s559_s2, %s559_s2 }
  0x10   :  { %p658_p2 = scmp.lt.s32.totalorder %s656_s13, %s652_s12 }
  0x12   :  { %624 = vmatmul.mubr.msk.bf16.gmra.mxu0 %vm120_vm0, %v650_v8  ;;  %632 = vmatmul.mubr.msk.bf16.gmra.mxu1 %vm120_vm0, %v651_v9  ;;  %p659_p3 = por %p658_p2, %p657_p1 }
  0x13   :  { %v354_v41 = vld [vmem:[#allocation2] sm:$0x1]  ;;  %v395_v44 = vld [vmem:[#allocation4] sm:$0x1] }
  0x14   :  { %p660_p4 = pnand %p659_p3, %p653_p0 }
  0xca   :  { %v621_v11 = vpop.f32.mrf.mxu0  ;;  %v629_v13 = vpop.f32.mrf.mxu1 }
  0xcc   :  { %v179_v14 = vpop.f32.mrf.mxu0  ;;  %v211_v15 = vpop.f32.mrf.mxu1 }
  0xcd   :  { %v180_v16 = vadd.f32 %v586_v12, %v179_v14 }
  0xce   :  { %v622_v17 = vpop.f32.mrf.mxu0  ;;  %v630_v18 = vpop.f32.mrf.mxu1 }
  0xcf   :  { %v355_v19 = vsel %vm120_vm0, %v180_v16, 0.0  ;;  %v396_v20 = vmul.f32 %v180_v16, %v180_v16 }
  0xd0   :  { %v386_v21 = vrot.slane %v355_v19, 4  ;;  %v182_v22 = vpop.f32.mrf.mxu0  ;;  %v214_v23 = vpop.f32.mrf.mxu1 }
  0xd1   :  { %v412_v24 = vsel %vm120_vm0, %v396_v20, 0.0 }
  0xd2   :  { %v387_v25 = vadd.f32 %v386_v21, %v355_v19  ;;  %v443_v26 = vrot.slane %v412_v24, 4  ;;  %v625_v27 = vpop.f32.mrf.mxu0  ;;  %v633_v28 = vpop.f32.mrf.mxu1 }
  0xd4   :  { %v388_v29 = vrot.slane %v387_v25, 2  ;;  %v444_v30 = vadd.f32 %v443_v26, %v412_v24  ;;  %v195_v31 = vpop.f32.mrf.mxu0  ;;  %v227_v32 = vpop.f32.mrf.mxu1 }
  0xd6   :  { %v389_v33 = vadd.f32 %v388_v29, %v387_v25  ;;  %v445_v34 = vrot.slane %v444_v30, 2  ;;  %v626_v35 = vpop.f32.mrf.mxu0  ;;  %v634_v36 = vpop.f32.mrf.mxu1 }
  0xd8   :  { %v390_v37 = vrot.slane %v389_v33, 1  ;;  %v446_v38 = vadd.f32 %v445_v34, %v444_v30  ;;  %v198_v39 = vpop.f32.mrf.mxu0  ;;  %v230_v40 = vpop.f32.mrf.mxu1 }
  0xda   :  { %v447_v42 = vrot.slane %v446_v38, 1  ;;  %v391_v43 = vadd.f32 %v390_v37, %v389_v33 }
  0xdc   :  { %v392_v45 = vadd.f32 %v391_v43, %v354_v41  ;;  %v448_v46 = vadd.f32 %v447_v42, %v446_v38 }
  0xde   :  { %394 = vst.msk [vmem:[#allocation2] sm:$0x1] %vm246_vm1, %v392_v45  ;;  %v449_v47 = vadd.f32 %v448_v46, %v395_v44 }
  0xdf   :  { %663 = shalt.err (!%p660_p4)
}
  0xe0   :  { %561 = dma.vmem_to_hbm [thread:$0]  %s559_s2, 16, %s780_s3, [#allocation3]   ;;  %450 = vst.msk [vmem:[#allocation4] sm:$0x1] %vm246_vm1, %v449_v47 }
  0xe1   :  { %s672_s16 = scalar_lea.vmem %s569_s11, 16  ;;  %s676_s17 = scalar_lea.vmem %s569_s11, 32 }
  0xe2   :  { %p673_p5 = scmp.ne.s32.totalorder %s569_s11, %s672_s16  ;;  %p677_p6 = scmp.lt.s32.totalorder %s569_s11, %s569_s11 }
  0xe3   :  { %p678_p7 = scmp.lt.s32.totalorder %s676_s17, %s672_s16 }
  0xe5   :  { %p679_p8 = por %p678_p7, %p677_p6 }
  0xe7   :  { %p680_p9 = pnand %p679_p8, %p673_p5 }
  0xe9   :  { %683 = shalt.err (!%p680_p9)
}
  0xea   :  { %571 = dma.vmem_to_hbm [thread:$0]  %s569_s11, 16, %s781_s4, [#allocation5]  }
  0xeb   :  { %692 = dma.done.wait [#allocation3], 16  }
  0xec   :  { %693 = vsyncadd [#allocation3], 4294967280 }
  0xed   :  { %694 = dma.done.wait [#allocation5], 16  }
  0xee   :  { %695 = vsyncadd [#allocation5], 4294967280 }
  0xef   :  { %578 = vsyncpa [#allocation3], 1 }
  0xf0   :  { %579 = vsyncpa [#allocation5], 1 }

</bundles_post_ra>
